<compile_context>
chip_gen: v6e
topology: v6e:2x2x1
jax: 0.10.0
libtpu: 0.0.40
codegen_flags: <defaults>
</compile_context>

<pallas_src>
import jax
import jax.numpy as jnp
from jax.experimental import pallas as pl
from jax.experimental.pallas import tpu as pltpu

LANE = 128
BF16_SUBLANE = 16  # bf16 packs (16, 128) per vreg


def _round_up(n, m):
    return ((n + m - 1) // m) * m


def _pad2(a, rows, cols):
    return jnp.pad(a, ((0, rows - a.shape[0]), (0, cols - a.shape[1])))


def _pick_tile_b(B):
    """Batch tile: small batches -> one 16-aligned step; large batches -> >=256-row
    tiles (fills v6e/v7x MXU M dim) while keeping >=2 grid steps for v7x's 2 TCs."""
    Br = _round_up(max(B, 1), BF16_SUBLANE)
    if Br <= 256:
        return Br                                   # single grid step
    if Br <= 1024:
        return _round_up(pl.cdiv(Br, 2), BF16_SUBLANE)   # exactly 2 grid steps
    return 512                                      # >=2 steps, M=512 fills the MXU


def dueling_kernel(x_ref, wfc_ref, bfc_ref, w1_ref, b1_ref, w2_ref, b2_ref, out_ref):
    # Shared trunk: ReLU(x @ Wfc + bfc)   (bf16 MXU operands, f32 accumulate)
    fc = jnp.dot(x_ref[...], wfc_ref[...], preferred_element_type=jnp.float32)
    fc = jnp.maximum(fc + bfc_ref[...], 0.0)

    # Fused adv|value hidden layer: one wide matmul produces [a_h | v_h].
    h = jnp.dot(fc.astype(jnp.bfloat16), w1_ref[...],
                preferred_element_type=jnp.float32)
    h = jnp.maximum(h + b1_ref[...], 0.0)

    # Fused output layer: dueling combine (value + adv - mean(adv)) already folded
    # into w2/b2 by prepare_params, so this is a single lane-dense matmul.
    out = jnp.dot(h.astype(jnp.bfloat16), w2_ref[...],
                  preferred_element_type=jnp.float32)
    out_ref[...] = (out + b2_ref[...]).astype(out_ref.dtype)


def prepare_params(params):
    """One-time weight fusion / padding / bf16 cast (params are static across calls).

    Returns a dict of kernel-ready operands:
      wfc (S, Hp) bf16, bfc (1, Hp) f32,
      w1  (Hp, 2Hp) bf16 = [wa1 | wv1], b1 (1, 2Hp) f32,
      w2  (2Hp, Np) bf16 with the dueling combine folded in, b2 (1, Np) f32.
    """
    f32, bf16 = jnp.float32, jnp.bfloat16
    state_dim, hidden = params["wfc"].shape
    n_actions = params["wa2"].shape[1]
    H_pad = _round_up(hidden, LANE)
    N_pad = _round_up(n_actions, LANE)

    wfc = _pad2(params["wfc"].astype(f32), state_dim, H_pad)
    bfc = _pad2(params["bfc"].astype(f32), 1, H_pad)

    # Hidden layer of both streams fused: [a_h | v_h] = ReLU(fc @ W1 + b1)
    w1 = jnp.concatenate([_pad2(params["wa1"].astype(f32), H_pad, H_pad),
                          _pad2(params["wv1"].astype(f32), H_pad, H_pad)], axis=1)
    b1 = jnp.concatenate([_pad2(params["ba1"].astype(f32), 1, H_pad),
                          _pad2(params["bv1"].astype(f32), 1, H_pad)], axis=1)

    # Output layer with the dueling combine folded in (exact f32 algebra):
    #   out[:, j] = a_h @ (wa2[:, j] - mean_k wa2[:, k]) + (ba2[j] - mean(ba2))
    #             + v_h @ wv2[:, 0] + bv2[0]
    wa2 = params["wa2"].astype(f32)
    ba2 = params["ba2"].astype(f32)
    wv2 = params["wv2"].astype(f32)
    bv2 = params["bv2"].astype(f32)
    w2_adv = wa2 - jnp.mean(wa2, axis=1, keepdims=True)          # (H, A)
    w2_val = jnp.broadcast_to(wv2, (hidden, n_actions))          # (H, A)
    b2 = (ba2 - jnp.mean(ba2)) + bv2[:, 0:1]                     # (1, A)
    w2 = jnp.concatenate([_pad2(w2_adv, H_pad, N_pad),
                          _pad2(w2_val, H_pad, N_pad)], axis=0)  # (2*Hp, Np)
    b2 = _pad2(b2, 1, N_pad)

    return dict(wfc=wfc.astype(bf16), bfc=bfc,
                w1=w1.astype(bf16), b1=b1,
                w2=w2.astype(bf16), b2=b2)


def dueling_forward(x, prep, *, n_actions):
    """x: (B, state_dim) float32. prep: output of prepare_params. Returns (B, n_actions) f32."""
    B, state_dim = x.shape
    H_pad = prep["wfc"].shape[1]
    K2 = prep["w1"].shape[1]          # 2 * H_pad
    N_pad = prep["w2"].shape[1]

    tile_b = _pick_tile_b(B)
    B_pad = _round_up(B, tile_b)
    grid = (B_pad // tile_b,)

    # Cast to bf16 BEFORE padding; no contraction-dim padding (full-last-dim block).
    x_p = jnp.pad(x.astype(jnp.bfloat16), ((0, B_pad - B), (0, 0)))

    flops = 2 * B_pad * (state_dim * H_pad + H_pad * K2 + K2 * N_pad)
    bytes_accessed = (
        B_pad * state_dim * 2                                     # x (bf16)
        + (prep["wfc"].size + prep["w1"].size + prep["w2"].size) * 2   # bf16 weights
        + (prep["bfc"].size + prep["b1"].size + prep["b2"].size) * 4   # f32 biases
        + B_pad * N_pad * 2)                                      # bf16 output
    cost = pl.CostEstimate(flops=flops, transcendentals=0,
                           bytes_accessed=bytes_accessed)

    bcast = lambda i: (0, 0)
    out = pl.pallas_call(
        dueling_kernel,
        out_shape=jax.ShapeDtypeStruct((B_pad, N_pad), jnp.bfloat16),
        grid=grid,
        in_specs=[
            pl.BlockSpec((tile_b, state_dim), lambda i: (i, 0)),  # x tile (K unpadded)
            pl.BlockSpec((state_dim, H_pad), bcast),              # wfc
            pl.BlockSpec((1, H_pad), bcast),                      # bfc
            pl.BlockSpec((H_pad, K2), bcast),                     # fused W1 (adv|value)
            pl.BlockSpec((1, K2), bcast),                         # fused b1
            pl.BlockSpec((K2, N_pad), bcast),                     # fused W2 (combine folded)
            pl.BlockSpec((1, N_pad), bcast),                      # fused b2
        ],
        out_specs=pl.BlockSpec((tile_b, N_pad), lambda i: (i, 0)),
        compiler_params=pltpu.CompilerParams(
            dimension_semantics=("parallel",)),
        cost_estimate=cost,
    )(x_p, prep["wfc"], prep["bfc"], prep["w1"], prep["b1"], prep["w2"], prep["b2"])

    # Slice + f32 cast fuse under jit with the pallas_call's output.
    return out[:B, :n_actions].astype(jnp.float32)


def init_params(key, state_dim, hidden, n_actions):
    """Deterministic synthetic init. Linear weights stored pre-transposed: (in, out).
    Biases stored as (1, out) rows for TPU-friendly broadcasting."""
    ks = jax.random.split(key, 10)

    def lin(kw, kb, fan_in, fan_out):
        bound = 1.0 / jnp.sqrt(fan_in)
        w = jax.random.uniform(kw, (fan_in, fan_out), jnp.float32, -bound, bound)
        b = jax.random.uniform(kb, (1, fan_out), jnp.float32, -bound, bound)
        return w, b

    wfc, bfc = lin(ks[0], ks[1], state_dim, hidden)
    wa1, ba1 = lin(ks[2], ks[3], hidden, hidden)
    wa2, ba2 = lin(ks[4], ks[5], hidden, n_actions)
    wv1, bv1 = lin(ks[6], ks[7], hidden, hidden)
    wv2, bv2 = lin(ks[8], ks[9], hidden, 1)
    return dict(wfc=wfc, bfc=bfc, wa1=wa1, ba1=ba1, wa2=wa2, ba2=ba2,
                wv1=wv1, bv1=bv1, wv2=wv2, bv2=bv2)


def reference_forward(x, p):
    """Pure-JAX f32 reference mirroring the PyTorch forward (for verification)."""
    fc = jnp.maximum(x @ p["wfc"] + p["bfc"], 0.0)
    adv = jnp.maximum(fc @ p["wa1"] + p["ba1"], 0.0) @ p["wa2"] + p["ba2"]
    val = jnp.maximum(fc @ p["wv1"] + p["bv1"], 0.0) @ p["wv2"] + p["bv2"]
    return val + adv - jnp.mean(adv, axis=1, keepdims=True)


if __name__ == "__main__":
    # Config implied by the module: fc trunk [state_dim -> hidden] (relu),
    # adv stream [hidden -> hidden (relu), hidden -> n_actions],
    # value stream [hidden -> hidden (relu), hidden -> 1].
    # TODO(synk): nn.Dropout(0.2) branches are train-mode only; forward here is eval-equivalent.
    batch, state_dim, hidden, n_actions = 8, 16, 128, 4

    key = jax.random.PRNGKey(0)
    kx, kp = jax.random.split(key)
    x = jax.random.normal(kx, (batch, state_dim), jnp.float32)
    params = init_params(kp, state_dim, hidden, n_actions)

    # One-time weight fusion (hoisted out of the per-call path).
    prep = prepare_params(params)
    prep = jax.block_until_ready(prep)

    fwd = jax.jit(dueling_forward, static_argnames=("n_actions",))
    out = fwd(x, prep, n_actions=n_actions)
    out = jax.block_until_ready(out)

    ref = reference_forward(x, params)
    assert out.shape == (batch, n_actions), f"bad shape {out.shape}"
    # bf16 MXU operands + bf16 stored output (f32 accumulation): relaxed tolerance
    # vs. the pure-f32 reference.
    assert jnp.allclose(out, ref, atol=5e-2, rtol=5e-2), "mismatch vs reference"

    print("KERNEL_OK")
</pallas_src>

<mosaic_0001>
module attributes {stable_mosaic.version = 11 : i64} {
  func.func @dueling_kernel(%arg0: i32, %arg1: memref<16x16xbf16, #tpu.memory_space<vmem>>, %arg2: memref<16x128xbf16, #tpu.memory_space<vmem>>, %arg3: memref<1x128xf32, #tpu.memory_space<vmem>>, %arg4: memref<128x256xbf16, #tpu.memory_space<vmem>>, %arg5: memref<1x256xf32, #tpu.memory_space<vmem>>, %arg6: memref<256x128xbf16, #tpu.memory_space<vmem>>, %arg7: memref<1x128xf32, #tpu.memory_space<vmem>>, %arg8: memref<16x128xbf16, #tpu.memory_space<vmem>>) attributes {dimension_semantics = [#tpu.dimension_semantics<parallel>], iteration_bounds = array<i64: 1>, scalar_prefetch = 0 : i64, scratch_operands = 0 : i64, tpu.core_type = #tpu.core_type<tc>, window_params = [{transform_indices = @transform_0, window_bounds = array<i64: 16, 16>}, {pipeline_mode = #tpu.pipeline_mode<synchronous>, transform_indices = @transform_1, window_bounds = array<i64: 16, 128>}, {pipeline_mode = #tpu.pipeline_mode<synchronous>, transform_indices = @transform_2, window_bounds = array<i64: 1, 128>}, {pipeline_mode = #tpu.pipeline_mode<synchronous>, transform_indices = @transform_3, window_bounds = array<i64: 128, 256>}, {pipeline_mode = #tpu.pipeline_mode<synchronous>, transform_indices = @transform_4, window_bounds = array<i64: 1, 256>}, {pipeline_mode = #tpu.pipeline_mode<synchronous>, transform_indices = @transform_5, window_bounds = array<i64: 256, 128>}, {pipeline_mode = #tpu.pipeline_mode<synchronous>, transform_indices = @transform_6, window_bounds = array<i64: 1, 128>}, {transform_indices = @transform_7, window_bounds = array<i64: 16, 128>}]} {
    %c0 = arith.constant 0 : index
    %c0_0 = arith.constant 0 : index
    %0 = vector.load %arg1[%c0, %c0_0] : memref<16x16xbf16, #tpu.memory_space<vmem>>, vector<16x16xbf16>
    %c0_1 = arith.constant 0 : index
    %c0_2 = arith.constant 0 : index
    %1 = vector.load %arg2[%c0_1, %c0_2] : memref<16x128xbf16, #tpu.memory_space<vmem>>, vector<16x128xbf16>
    %cst = arith.constant dense<0.000000e+00> : vector<16x128xf32>
    %2 = tpu.matmul %0, %1, %cst {dimension_numbers = #tpu.dot_dimension_numbers<[1], [0], [0], [1], [0, 0, 1, 1], [], []>} : vector<16x16xbf16>, vector<16x128xbf16>, vector<16x128xf32> -> vector<16x128xf32>
    %c0_3 = arith.constant 0 : index
    %c0_4 = arith.constant 0 : index
    %3 = vector.load %arg3[%c0_3, %c0_4] : memref<1x128xf32, #tpu.memory_space<vmem>>, vector<1x128xf32>
    %4 = vector.broadcast %3 : vector<1x128xf32> to vector<16x128xf32>
    %5 = arith.addf %2, %4 : vector<16x128xf32>
    %cst_5 = arith.constant 0.000000e+00 : f32
    %6 = vector.broadcast %cst_5 : f32 to vector<16x128xf32>
    %7 = arith.maximumf %5, %6 : vector<16x128xf32>
    %8 = arith.truncf %7 : vector<16x128xf32> to vector<16x128xbf16>
    %c0_6 = arith.constant 0 : index
    %c0_7 = arith.constant 0 : index
    %9 = vector.load %arg4[%c0_6, %c0_7] : memref<128x256xbf16, #tpu.memory_space<vmem>>, vector<128x256xbf16>
    %cst_8 = arith.constant dense<0.000000e+00> : vector<16x256xf32>
    %10 = tpu.matmul %8, %9, %cst_8 {dimension_numbers = #tpu.dot_dimension_numbers<[1], [0], [0], [1], [0, 0, 1, 1], [], []>} : vector<16x128xbf16>, vector<128x256xbf16>, vector<16x256xf32> -> vector<16x256xf32>
    %c0_9 = arith.constant 0 : index
    %c0_10 = arith.constant 0 : index
    %11 = vector.load %arg5[%c0_9, %c0_10] : memref<1x256xf32, #tpu.memory_space<vmem>>, vector<1x256xf32>
    %12 = vector.broadcast %11 : vector<1x256xf32> to vector<16x256xf32>
    %13 = arith.addf %10, %12 : vector<16x256xf32>
    %cst_11 = arith.constant 0.000000e+00 : f32
    %14 = vector.broadcast %cst_11 : f32 to vector<16x256xf32>
    %15 = arith.maximumf %13, %14 : vector<16x256xf32>
    %16 = arith.truncf %15 : vector<16x256xf32> to vector<16x256xbf16>
    %c0_12 = arith.constant 0 : index
    %c0_13 = arith.constant 0 : index
    %17 = vector.load %arg6[%c0_12, %c0_13] : memref<256x128xbf16, #tpu.memory_space<vmem>>, vector<256x128xbf16>
    %cst_14 = arith.constant dense<0.000000e+00> : vector<16x128xf32>
    %18 = tpu.matmul %16, %17, %cst_14 {dimension_numbers = #tpu.dot_dimension_numbers<[1], [0], [0], [1], [0, 0, 1, 1], [], []>} : vector<16x256xbf16>, vector<256x128xbf16>, vector<16x128xf32> -> vector<16x128xf32>
    %c0_15 = arith.constant 0 : index
    %c0_16 = arith.constant 0 : index
    %19 = vector.load %arg7[%c0_15, %c0_16] : memref<1x128xf32, #tpu.memory_space<vmem>>, vector<1x128xf32>
    %20 = vector.broadcast %19 : vector<1x128xf32> to vector<16x128xf32>
    %21 = arith.addf %18, %20 : vector<16x128xf32>
    %22 = arith.truncf %21 : vector<16x128xf32> to vector<16x128xbf16>
    %c0_17 = arith.constant 0 : index
    %c0_18 = arith.constant 0 : index
    %23 = vector.load %arg8[%c0_17, %c0_18] : memref<16x128xbf16, #tpu.memory_space<vmem>>, vector<16x128xbf16>
    tpu.vector_store %arg8[%c0_17, %c0_18], %22 {strides = array<i32>} : memref<16x128xbf16, #tpu.memory_space<vmem>>, vector<16x128xbf16>,
    return
  }
  func.func @transform_0(%arg0: i32) -> (i32, i32) {
    %c0_i32 = arith.constant 0 : i32
    %c0_i32_0 = arith.constant 0 : i32
    return %arg0, %c0_i32 : i32, i32
  }
  func.func @transform_1(%arg0: i32) -> (i32, i32) {
    %c0_i32 = arith.constant 0 : i32
    %c0_i32_0 = arith.constant 0 : i32
    %c0_i32_1 = arith.constant 0 : i32
    return %c0_i32, %c0_i32_0 : i32, i32
  }
  func.func @transform_2(%arg0: i32) -> (i32, i32) {
    %c0_i32 = arith.constant 0 : i32
    %c0_i32_0 = arith.constant 0 : i32
    %c0_i32_1 = arith.constant 0 : i32
    return %c0_i32, %c0_i32_0 : i32, i32
  }
  func.func @transform_3(%arg0: i32) -> (i32, i32) {
    %c0_i32 = arith.constant 0 : i32
    %c0_i32_0 = arith.constant 0 : i32
    %c0_i32_1 = arith.constant 0 : i32
    return %c0_i32, %c0_i32_0 : i32, i32
  }
  func.func @transform_4(%arg0: i32) -> (i32, i32) {
    %c0_i32 = arith.constant 0 : i32
    %c0_i32_0 = arith.constant 0 : i32
    %c0_i32_1 = arith.constant 0 : i32
    return %c0_i32, %c0_i32_0 : i32, i32
  }
  func.func @transform_5(%arg0: i32) -> (i32, i32) {
    %c0_i32 = arith.constant 0 : i32
    %c0_i32_0 = arith.constant 0 : i32
    %c0_i32_1 = arith.constant 0 : i32
    return %c0_i32, %c0_i32_0 : i32, i32
  }
  func.func @transform_6(%arg0: i32) -> (i32, i32) {
    %c0_i32 = arith.constant 0 : i32
    %c0_i32_0 = arith.constant 0 : i32
    %c0_i32_1 = arith.constant 0 : i32
    return %c0_i32, %c0_i32_0 : i32, i32
  }
  func.func @transform_7(%arg0: i32) -> (i32, i32) {
    %c0_i32 = arith.constant 0 : i32
    %c0_i32_0 = arith.constant 0 : i32
    return %arg0, %c0_i32 : i32, i32
  }
}

</mosaic_0001>

<bundles_post_ra>
// kernel: dueling_forward.1
= control target key start
LH: loop header
LB: loop body
LE: loop exit
PB: predicated region body
PF: predicated region fallthrough
CT: control target
= control target key end

     0   :  { %12 = vsyncpa [#allocation3], 0  ;;  %s718_s0 = inlined_call_operand.vmem [shape: bf16[16,16], index: 0, kind: input, shape index: {}]   ;;  %s719_s1 = inlined_call_operand.vmem [shape: bf16[16,128], index: 1, kind: input, shape index: {}]   ;;  %s720_s2 = inlined_call_operand.vmem [shape: f32[1,128], index: 2, kind: input, shape index: {}]   ;;  %s721_s3 = inlined_call_operand.hbm [shape: bf16[128,256], index: 3, kind: input, shape index: {}]   ;;  %s722_s4 = inlined_call_operand.vmem [shape: f32[1,256], index: 4, kind: input, shape index: {}]   ;;  %s723_s5 = inlined_call_operand.hbm [shape: bf16[256,128], index: 5, kind: input, shape index: {}]   ;;  %s724_s6 = inlined_call_operand.vmem [shape: f32[1,128], index: 6, kind: input, shape index: {}]   ;;  %s725_s7 = inlined_call_operand.vmem [shape: bf16[16,128], index: 7, kind: output, shape index: {}]  }
   0x1   :  { %13 = vsyncpa [#allocation5], 0  ;;  %s645_s24 = smov [#allocation2]  }
   0x2   :  { %s25_s25 = sshll.u32 %s645_s24, 4  ;;  %s26_s25 = int_to_ptr.vmem [resolvable:$true] %s25_s25 }
   0x3   :  { %s609_s26 = scalar_lea.vmem %s26_s25, 2048  ;;  %p614_p1 = scmp.lt.s32.totalorder %s26_s25, %s26_s25 }
   0x4   :  { %p610_p0 = scmp.ne.s32.totalorder %s26_s25, %s609_s26  ;;  %p615_p2 = scmp.lt.s32.totalorder %s609_s26, %s609_s26 }
   0x6   :  { %p616_p3 = por %p615_p2, %p614_p1 }
   0x8   :  { %p617_p4 = pnand %p616_p3, %p610_p0 }
   0xa   :  { %620 = shalt.err (!%p617_p4)
}
   0xb   :  { %s646_s27 = smov 128   ;;  %s647_s28 = smov 8  }
   0xc   :  { %31 = dma.hbm_to_vmem [thread:$0]  %s721_s3, 2048, %s26_s25, [#allocation3], %s646_s27, %s646_s27, %s647_s28  }
   0xd   :  { %s648_s8 = smov [#allocation4]  }
   0xe   :  { %s39_s9 = sshll.u32 %s648_s8, 4  ;;  %s40_s9 = int_to_ptr.vmem [resolvable:$true] %s39_s9 }
   0xf   :  { %s629_s10 = scalar_lea.vmem %s40_s9, 2048  ;;  %p634_p6 = scmp.lt.s32.totalorder %s40_s9, %s40_s9 }
  0x10   :  { %p630_p5 = scmp.ne.s32.totalorder %s40_s9, %s629_s10  ;;  %p635_p7 = scmp.lt.s32.totalorder %s629_s10, %s629_s10 }
  0x12   :  { %p636_p8 = por %p635_p7, %p634_p6 }
  0x14   :  { %p637_p9 = pnand %p636_p8, %p630_p5 }
  0x16   :  { %640 = shalt.err (!%p637_p9)
}
  0x17   :  { %s649_s11 = smov 64   ;;  %s650_s12 = smov 4  }
  0x18   :  { %45 = dma.hbm_to_vmem [thread:$0]  %s723_s5, 2048, %s40_s9, [#allocation5], %s649_s11, %s649_s11, %s650_s12  }
  0x19   :  { %641 = dma.done.wait [#allocation3], 2048  }
  0x1a   :  { %642 = vsyncadd [#allocation3], 4294965248 }
  0x1b   :  { %643 = dma.done.wait [#allocation5], 2048  }
  0x1c   :  { %644 = vsyncadd [#allocation5], 4294965248  ;;  %v651_v0 = vmov 0.0   ;;  %vm652_vm0 = vmmov 0   ;;  %v559_v1 = vld [vmem:[%s719_s1] sm:$0xff]   ;;  %vm77_vm1 = vcmask 130048   ;;  %v143_v46 = vlaneseq }
  0x1d   :  { %544 = vmatprep.subr.bf16.mxu0 %v651_v0  ;;  %546 = vmatprep.mubr.msk.bf16.mxu0 %vm652_vm0, %v651_v0  ;;  %v560_v2 = vld [vmem:[%s718_s0] sm:$0xff]   ;;  %v561_v3 = vld [vmem:[#allocation2 + $0x74] ss:$8 sps:$4 sm:$0xff]   ;;  %v563_v4 = vld [vmem:[#allocation2 + $0x70] ss:$8 sps:$4 sm:$0xff]   ;;  %v653_v19 = vmov 0  }
  0x1e   :  { %545 = vmatpush3.bf16.msra.mxu0 %v559_v1  ;;  %233 = vmatprep.subr.bf16.mxu1 %v561_v3  ;;  %v564_v5 = vld [vmem:[#allocation2 + $0x64] ss:$8 sps:$4 sm:$0xff]   ;;  %v566_v6 = vld [vmem:[#allocation2 + $0x60] ss:$8 sps:$4 sm:$0xff]   ;;  %v567_v7 = vld [vmem:[#allocation2 + $0x54] ss:$8 sps:$4 sm:$0xff]  }
  0x1f   :  { %234 = vmatpush1.bf16.msra.mxu1 %v563_v4  ;;  %v569_v8 = vld [vmem:[#allocation2 + $0x50] ss:$8 sps:$4 sm:$0xff]   ;;  %v570_v9 = vld [vmem:[#allocation2 + $0x44] ss:$8 sps:$4 sm:$0xff]   ;;  %v572_v10 = vld [vmem:[#allocation2 + $0x40] ss:$8 sps:$4 sm:$0xff]   ;;  %265 = vmatprep.mubr.bf16.mxu1 %v653_v19 }
  0x20   :  { %235 = vmatprep.subr.bf16.mxu1 %v564_v5  ;;  %v573_v11 = vld [vmem:[#allocation2 + $0x34] ss:$8 sps:$4 sm:$0xff]   ;;  %v575_v12 = vld [vmem:[#allocation2 + $0x30] ss:$8 sps:$4 sm:$0xff]   ;;  %v576_v13 = vld [vmem:[#allocation2 + $0x24] ss:$8 sps:$4 sm:$0xff]  }
  0x21   :  { %547 = vmatmul.mubr.msk.bf16.vlgmr.msra.gmra.mxu0 %vm77_vm1, %v560_v2  ;;  %v578_v14 = vld [vmem:[#allocation2 + $0x20] ss:$8 sps:$4 sm:$0xff]   ;;  %v579_v15 = vld [vmem:[#allocation2 + $0x14] ss:$8 sps:$4 sm:$0xff]   ;;  %v581_v16 = vld [vmem:[#allocation2 + $0x10] ss:$8 sps:$4 sm:$0xff]  }
  0x22   :  { %v582_v17 = vld [vmem:[#allocation2 + $0x4] ss:$8 sps:$4 sm:$0xff]   ;;  %v584_v18 = vld [vmem:[#allocation2] ss:$8 sps:$4 sm:$0xff]   ;;  %v585_v20 = vld [vmem:[#allocation4 + $0x78] sm:$0xff]   ;;  %v144_v47 = vshrl.u32 %v143_v46, 7 }
  0x23   :  { %236 = vmatpush1.bf16.msra.mxu1 %v566_v6  ;;  %v586_v21 = vld [vmem:[#allocation4 + $0x38] sm:$0xff]   ;;  %v587_v22 = vld [vmem:[#allocation4 + $0x70] sm:$0xff]   ;;  %522 = vmatprep.subr.bf16.mxu0 %v585_v20  ;;  %v589_v24 = vld [vmem:[#allocation4 + $0x68] sm:$0xff]  }
  0x24   :  { %237 = vmatprep.subr.bf16.mxu1 %v567_v7  ;;  %523 = vmatpush3.bf16.msra.mxu0 %v586_v21  ;;  %v588_v23 = vld [vmem:[#allocation4 + $0x30] sm:$0xff]   ;;  %v590_v25 = vld [vmem:[#allocation4 + $0x28] sm:$0xff]   ;;  %v591_v26 = vld [vmem:[#allocation4 + $0x60] sm:$0xff]   ;;  %v149_v48 = vsub.s32 1, %v144_v47  ;;  %v145_v49 = vsub.s32 0, %v144_v47 }
  0x25   :  { %524 = vmatprep.subr.bf16.mxu0 %v587_v22  ;;  %v592_v27 = vld [vmem:[#allocation4 + $0x20] sm:$0xff]   ;;  %v593_v28 = vld [vmem:[#allocation4 + $0x58] sm:$0xff]   ;;  %v595_v40 = vld [vmem:[#allocation4 + $0x50] sm:$0xff]  }
  0x26   :  { %v594_v29 = vld [vmem:[#allocation4 + $0x18] sm:$0xff]   ;;  %v474_v30 = vld [vmem:[%s720_s2] ss:$0 sm:$0xff]  ;;  %v596_v41 = vld [vmem:[#allocation4 + $0x10] sm:$0xff]  }
  0x27   :  { %238 = vmatpush1.bf16.msra.mxu1 %v569_v8  ;;  %v597_v42 = vld [vmem:[#allocation4 + $0x48] sm:$0xff]   ;;  %v599_v44 = vld [vmem:[#allocation4 + $0x40] sm:$0xff]  }
  0x28   :  { %239 = vmatprep.subr.bf16.mxu1 %v570_v9  ;;  %525 = vmatpush3.bf16.msra.mxu0 %v588_v23  ;;  %v598_v43 = vld [vmem:[#allocation4 + $0x8] sm:$0xff]   ;;  %v600_v45 = vld [vmem:[#allocation4] sm:$0xff]  }
  0x29   :  { %526 = vmatprep.subr.bf16.mxu0 %v589_v24  ;;  %v141_v50 = vld [vmem:[%s722_s4] sm:$0x3] }
  0x2a   :  { %v150_v52 = vrot.slane %v141_v50, %v149_v48  ;;  %v146_v53 = vrot.slane %v141_v50, %v145_v49  ;;  %v494_v7 = vld [vmem:[%s724_s6] ss:$0 sm:$0xff] }
  0x2b   :  { %240 = vmatpush1.bf16.msra.mxu1 %v572_v10 }
  0x2c   :  { %241 = vmatprep.subr.bf16.mxu1 %v573_v11  ;;  %527 = vmatpush3.bf16.msra.mxu0 %v590_v25 }
  0x2d   :  { %528 = vmatprep.subr.bf16.mxu0 %v591_v26 }
  0x2f   :  { %242 = vmatpush1.bf16.msra.mxu1 %v575_v12 }
  0x30   :  { %243 = vmatprep.subr.bf16.mxu1 %v576_v13  ;;  %529 = vmatpush3.bf16.msra.mxu0 %v592_v27 }
  0x31   :  { %530 = vmatprep.subr.bf16.mxu0 %v593_v28 }
  0x33   :  { %244 = vmatpush1.bf16.msra.mxu1 %v578_v14 }
  0x34   :  { %245 = vmatprep.subr.bf16.mxu1 %v579_v15  ;;  %531 = vmatpush3.bf16.msra.mxu0 %v594_v29 }
  0x35   :  { %532 = vmatprep.subr.bf16.mxu0 %v595_v40 }
  0x37   :  { %246 = vmatpush1.bf16.msra.mxu1 %v581_v16 }
  0x38   :  { %247 = vmatprep.subr.bf16.mxu1 %v582_v17  ;;  %533 = vmatpush3.bf16.msra.mxu0 %v596_v41 }
  0x39   :  { %534 = vmatprep.subr.bf16.mxu0 %v597_v42 }
  0x3b   :  { %248 = vmatpush1.bf16.msra.mxu1 %v584_v18 }
  0x3c   :  { %535 = vmatpush3.bf16.msra.mxu0 %v598_v43 }
  0x3d   :  { %536 = vmatprep.subr.bf16.mxu0 %v599_v44 }
  0x40   :  { %537 = vmatpush3.bf16.msra.mxu0 %v600_v45 }
  0xe1   :  { %v115_v31 = vpop.f32.mrf.mxu0 }
  0xe2   :  { %v116_v33 = vadd.f32 %v474_v30, %v115_v31 }
  0xe3   :  { %v548_v32 = vpop.f32.mrf.mxu0 }
  0xe4   :  { %v122_v37 = vmax.f32 %v116_v33, 0.0 }
  0xe5   :  { %v118_v34 = vpop.f32.mrf.mxu0 }
  0xe6   :  { %v119_v35 = vadd.f32 %v474_v30, %v118_v34 }
  0xe7   :  { %v549_v36 = vpop.f32.mrf.mxu0 }
  0xe8   :  { %v123_v38 = vmax.f32 %v119_v35, 0.0 }
  0xea   :  { %v124_v39 = vpack.c.bf16 %v123_v38, %v122_v37 }
  0xec   :  { %266 = vmatmul.mubr.bf16.vlgmr.msra.gmra.mxu1 %v124_v39 }
 0x1ac   :  { %v267_v51 = vpop.f32.mrf.mxu1 }
 0x1ad   :  { %v268_v58 = vadd.f32 %v267_v51, %v146_v53 }
 0x1ae   :  { %v269_v54 = vpop.f32.mrf.mxu1 }
 0x1af   :  { %v270_v56 = vadd.f32 %v269_v54, %v150_v52  ;;  %v276_v0 = vmax.f32 %v268_v58, 0.0 }
 0x1b0   :  { %v271_v55 = vpop.f32.mrf.mxu1 }
 0x1b1   :  { %v272_v57 = vadd.f32 %v271_v55, %v146_v53  ;;  %v277_v62 = vmax.f32 %v270_v56, 0.0 }
 0x1b2   :  { %v273_v59 = vpop.f32.mrf.mxu1 }
 0x1b3   :  { %v274_v60 = vadd.f32 %v273_v59, %v150_v52  ;;  %v278_v61 = vmax.f32 %v272_v57, 0.0 }
 0x1b5   :  { %v279_v63 = vmax.f32 %v274_v60, 0.0  ;;  %v280_v2 = vpack.c.bf16 %v278_v61, %v276_v0 }
 0x1b7   :  { %v281_v1 = vpack.c.bf16 %v279_v63, %v277_v62 }
 0x1b9   :  { %449 = vmatprep.mubr.bf16.mxu0 %v281_v1 }
 0x1ba   :  { %450 = vmatmul.mubr.bf16.vlgmr.msra.gmra.mxu0 %v280_v2 }
 0x27a   :  { %v538_v3 = vpop.f32.mrf.mxu0 }
 0x27c   :  { %v539_v4 = vpop.f32.mrf.mxu0 }
 0x27d   :  { %v540_v6 = vadd.f32 %v539_v4, %v538_v3 }
 0x27e   :  { %v541_v5 = vpop.f32.mrf.mxu0 }
 0x27f   :  { %v452_v10 = vadd.f32 %v540_v6, %v494_v7 }
 0x280   :  { %v542_v8 = vpop.f32.mrf.mxu0 }
 0x281   :  { %v543_v9 = vadd.f32 %v542_v8, %v541_v5 }
 0x283   :  { %v455_v11 = vadd.f32 %v543_v9, %v494_v7 }
 0x285   :  { %v518_v12 = vpack.c.bf16 %v455_v11, %v452_v10 }
 0x287   :  { %519 = vst [vmem:[%s725_s7] sm:$0xff] %v518_v12  }
 0x288   :  { %472 = vsyncpa [#allocation3], 1 }
 0x289   :  { %473 = vsyncpa [#allocation5], 1 }

</bundles_post_ra>
